<compile_context>
chip_gen: v7x
topology: tpu7x:2x2x1
jax: 0.10.0
libtpu: 0.0.40
codegen_flags: <defaults>
</compile_context>

<pallas_src>
import functools
import math

import jax
import jax.numpy as jnp
from jax.experimental import pallas as pl
from jax.experimental.pallas import tpu as pltpu


def _round_up(x, m):
    return ((x + m - 1) // m) * m


# ---------------------------------------------------------------------------
# Pallas kernel 1: fused tiled matmul
#   out = LayerNorm( act(x @ w + b) + residual )     (every piece optional)
# ---------------------------------------------------------------------------
def _linear_kernel(*refs, activation, has_residual, has_ln, ln_eps):
    it = iter(refs)
    x_ref, w_ref, b_ref = next(it), next(it), next(it)
    r_ref = next(it) if has_residual else None
    g_ref = next(it) if has_ln else None
    bb_ref = next(it) if has_ln else None
    o_ref = next(it)
    acc_ref = next(it)

    @pl.when(pl.program_id(2) == 0)
    def _():
        acc_ref[...] = jnp.zeros_like(acc_ref)

    acc_ref[...] += jnp.dot(x_ref[...], w_ref[...],
                            preferred_element_type=jnp.float32)

    @pl.when(pl.program_id(2) == pl.num_programs(2) - 1)
    def _():
        out = acc_ref[...] + b_ref[...].astype(jnp.float32)
        if activation == "relu":
            out = jnp.maximum(out, 0.0)
        if r_ref is not None:
            out = out + r_ref[...].astype(jnp.float32)
        if g_ref is not None:
            # LayerNorm over the feature axis; valid because tn == N (one output tile
            # spans the full feature dim).
            mu = jnp.mean(out, axis=-1, keepdims=True)
            var = jnp.mean(jnp.square(out - mu), axis=-1, keepdims=True)
            out = (out - mu) * jax.lax.rsqrt(var + ln_eps)
            out = out * g_ref[...].astype(jnp.float32) + bb_ref[...].astype(jnp.float32)
        o_ref[...] = out.astype(o_ref.dtype)


def fused_linear(x, w, b=None, residual=None, activation=None, layernorm=None,
                 compute_dtype=None, out_dtype=jnp.float32, ln_eps=1e-5):
    """LN( act(x @ w + b) + residual ) with divisor tiles (no N/K padding for this model).

    NOTE: the activation (if requested) is applied BEFORE the residual add.
    """
    M, K = x.shape
    Kw, N = w.shape
    assert K == Kw
    cd = compute_dtype if compute_dtype is not None else jnp.float32
    xc = x.astype(cd)
    wc = w.astype(cd)

    # Tile selection: full-N block, full-K block (<=2048), M padded only to a multiple of 8
    # and tiled with a divisor of Mp (no padded-output slices beyond <=7 rows).
    Mp = _round_up(M, 8)
    tm = min(512, Mp)
    while Mp % tm:
        tm -= 8
    tn = N
    if K <= 2048:
        tk, Kp = K, K
    else:
        tk = 512
        Kp = _round_up(K, tk)

    if Mp != M or Kp != K:
        xc = jnp.pad(xc, ((0, Mp - M), (0, Kp - K)))
    if Kp != K:
        wc = jnp.pad(wc, ((0, Kp - K), (0, 0)))
    if b is None:
        b = jnp.zeros((N,), jnp.float32)
    b2 = b.astype(jnp.float32).reshape(1, N)

    operands = [xc, wc, b2]
    in_specs = [pl.BlockSpec((tm, tk), lambda i, j, k: (i, k)),
                pl.BlockSpec((tk, tn), lambda i, j, k: (k, j)),
                pl.BlockSpec((1, tn), lambda i, j, k: (0, j))]

    has_residual = residual is not None
    if has_residual:
        r = residual.astype(jnp.float32)
        if Mp != M:
            r = jnp.pad(r, ((0, Mp - M), (0, 0)))
        operands.append(r)
        # With full-K blocks (the common case here) the K grid has 1 step, so the residual
        # is only DMA'd once.
        in_specs.append(pl.BlockSpec((tm, tn), lambda i, j, k: (i, j)))

    has_ln = layernorm is not None
    if has_ln:
        g, bb = layernorm
        operands += [g.astype(jnp.float32).reshape(1, N),
                     bb.astype(jnp.float32).reshape(1, N)]
        in_specs += [pl.BlockSpec((1, tn), lambda i, j, k: (0, j)),
                     pl.BlockSpec((1, tn), lambda i, j, k: (0, j))]

    out = pl.pallas_call(
        functools.partial(_linear_kernel, activation=activation,
                          has_residual=has_residual, has_ln=has_ln, ln_eps=ln_eps),
        out_shape=jax.ShapeDtypeStruct((Mp, N), out_dtype),
        grid=(Mp // tm, 1, Kp // tk),
        in_specs=in_specs,
        out_specs=pl.BlockSpec((tm, tn), lambda i, j, k: (i, j)),
        scratch_shapes=[pltpu.VMEM((tm, tn), jnp.float32)],
        compiler_params=pltpu.CompilerParams(
            dimension_semantics=("parallel", "parallel", "arbitrary")),
    )(*operands)
    return out[:M] if Mp != M else out


# ---------------------------------------------------------------------------
# Pallas kernel 2: Conv1d(k=3, padding=1) + bias + ReLU, channels-last, no im2col.
#   One (batch*window) element per grid step; three shifted-window reads of the padded
#   (T+2, Cin) tile feed three accumulating MXU dots.  Optional mean-over-T epilogue
#   (AdaptiveAvgPool1d(1)).
# ---------------------------------------------------------------------------
def _conv1d3_kernel(x_ref, w_ref, b_ref, o_ref, *, mean_over_t):
    T = x_ref.shape[0] - 2
    acc = jnp.dot(x_ref[pl.ds(0, T), :], w_ref[0], preferred_element_type=jnp.float32)
    acc += jnp.dot(x_ref[pl.ds(1, T), :], w_ref[1], preferred_element_type=jnp.float32)
    acc += jnp.dot(x_ref[pl.ds(2, T), :], w_ref[2], preferred_element_type=jnp.float32)
    acc += b_ref[...].astype(jnp.float32)
    acc = jnp.maximum(acc, 0.0)                       # every conv block in the model has ReLU
    if mean_over_t:
        o_ref[...] = jnp.mean(acc, axis=0, keepdims=True).astype(o_ref.dtype)
    else:
        o_ref[...] = acc.astype(o_ref.dtype)


def conv1d_k3_relu(x, w3, b, *, mean_over_t=False,
                   compute_dtype=jnp.bfloat16, out_dtype=None):
    """x: (BW, T, Cin) channels-last; w3: (3, Cin, Cout); returns (BW, T, Cout) or (BW, Cout)."""
    BW, T, Cin = x.shape
    Cout = w3.shape[-1]
    out_dtype = out_dtype if out_dtype is not None else compute_dtype
    xp = jnp.pad(x.astype(compute_dtype), ((0, 0), (1, 1), (0, 0)))   # zero pad along time
    wc = w3.astype(compute_dtype)
    bc = b.astype(jnp.float32).reshape(1, Cout)
    out_t = 1 if mean_over_t else T
    out = pl.pallas_call(
        functools.partial(_conv1d3_kernel, mean_over_t=mean_over_t),
        out_shape=jax.ShapeDtypeStruct((BW, out_t, Cout), out_dtype),
        grid=(BW,),
        in_specs=[pl.BlockSpec((None, T + 2, Cin), lambda i: (i, 0, 0)),
                  pl.BlockSpec((3, Cin, Cout), lambda i: (0, 0, 0)),
                  pl.BlockSpec((1, Cout), lambda i: (0, 0))],
        out_specs=pl.BlockSpec((None, out_t, Cout), lambda i: (i, 0, 0)),
        compiler_params=pltpu.CompilerParams(dimension_semantics=("parallel",)),
    )(xp, wc, bc)
    return out.reshape(BW, Cout) if mean_over_t else out


def _conv_bn_relu_block(x, params, idx, mean_over_t=False, eps=1e-5):
    """BatchNorm1d (eval running stats) folded into the conv weights/bias."""
    w, b = params[f"conv{idx}_w"], params[f"conv{idx}_b"]            # torch (Cout, Cin, 3)
    scale = params[f"bn{idx}_gamma"] * jax.lax.rsqrt(params[f"bn{idx}_var"] + eps)
    w3 = (w * scale[:, None, None]).transpose(2, 1, 0)               # (3, Cin, Cout)
    bf = (b - params[f"bn{idx}_mean"]) * scale + params[f"bn{idx}_beta"]
    return conv1d_k3_relu(x, w3, bf, mean_over_t=mean_over_t,
                          out_dtype=jnp.float32 if mean_over_t else None)


def _maxpool_t(x):
    # TODO(synk): MaxPool1d(2) stays as a cheap channels-last JAX reduce (C on lanes, no
    # relayout); fusing it into the conv epilogue is possible but low value.
    BW, T, C = x.shape
    return jnp.max(x[:, :(T // 2) * 2, :].reshape(BW, T // 2, 2, C), axis=2)


# ---------------------------------------------------------------------------
# Pallas kernel 3: softmax(Q K^T / sqrt(dh)) V, many (batch*head) problems per grid step.
#   Assumes no padding of Lq/Lk/dh (no key masking).
# ---------------------------------------------------------------------------
def _mha_kernel(q_ref, k_ref, v_ref, o_ref, *, scale):
    q = q_ref[...].astype(jnp.float32) * scale          # (G, Lq, dh)
    k = k_ref[...].astype(jnp.float32)                  # (G, Lk, dh)
    v = v_ref[...].astype(jnp.float32)
    s = jnp.einsum("gqd,gkd->gqk", q, k, preferred_element_type=jnp.float32)
    m = jnp.max(s, axis=-1, keepdims=True)
    p = jnp.exp(s - m)
    denom = jnp.sum(p, axis=-1, keepdims=True)
    o = jnp.einsum("gqk,gkd->gqd", p, v, preferred_element_type=jnp.float32)
    o = o * pl.reciprocal(denom, approx=True)
    o_ref[...] = o.astype(o_ref.dtype)


def mha_attention(q, k, v):
    """q: (BH, Lq, dh); k, v: (BH, Lk, dh) -> (BH, Lq, dh); groups many heads per grid step."""
    BH, Lq, dh = q.shape
    _, Lk, _ = k.shape
    scale = 1.0 / math.sqrt(dh)
    per_bytes = 4 * (2 * Lq * dh + 2 * Lk * dh + 2 * Lq * Lk)
    budget = 4 * 1024 * 1024
    g = BH
    while g > 1 and (BH % g != 0 or per_bytes * g > budget):
        g -= 1
    return pl.pallas_call(
        functools.partial(_mha_kernel, scale=scale),
        out_shape=jax.ShapeDtypeStruct((BH, Lq, dh), q.dtype),
        grid=(BH // g,),
        in_specs=[pl.BlockSpec((g, Lq, dh), lambda i: (i, 0, 0)),
                  pl.BlockSpec((g, Lk, dh), lambda i: (i, 0, 0)),
                  pl.BlockSpec((g, Lk, dh), lambda i: (i, 0, 0))],
        out_specs=pl.BlockSpec((g, Lq, dh), lambda i: (i, 0, 0)),
        compiler_params=pltpu.CompilerParams(dimension_semantics=("parallel",)),
    )(q, k, v)


# ---------------------------------------------------------------------------
# Module pieces built on the Pallas kernels
# ---------------------------------------------------------------------------
def make_positional_encoding_table(d_model, max_len=500, dtype=jnp.float32):
    position = jnp.arange(0, max_len, dtype=jnp.float32)[:, None]
    div_term = jnp.exp(jnp.arange(0, d_model, 2, dtype=jnp.float32)
                       * (-jnp.log(jnp.float32(10000.0)) / d_model))
    pe = jnp.zeros((max_len, d_model), jnp.float32)
    pe = pe.at[:, 0::2].set(jnp.sin(position * div_term))
    pe = pe.at[:, 1::2].set(jnp.cos(position * div_term))
    return pe.astype(dtype)


def _encoder_layer(x, p, heads):
    """One nn.TransformerEncoderLayer (post-norm, ReLU, eval dropout). x: (S, Nb, E) with
    axis 0 as the sequence axis (faithful batch_first=False reproduction)."""
    S, Nb, E = x.shape
    dh = E // heads
    x2d = x.reshape(S * Nb, E)
    qkv = fused_linear(x2d, p["w_qkv"], p["b_qkv"])                     # fused QKV projection
    q, k, v = jnp.split(qkv, 3, axis=-1)

    def to_heads(t):
        return (t.reshape(S, Nb, heads, dh).transpose(1, 2, 0, 3).reshape(Nb * heads, S, dh))

    o = mha_attention(to_heads(q), to_heads(k), to_heads(v))            # (Nb*H, S, dh)
    o = o.reshape(Nb, heads, S, dh).transpose(2, 0, 1, 3).reshape(S * Nb, E)
    # out-proj with residual add AND LayerNorm fused into the matmul epilogue
    h1 = fused_linear(o, p["w_o"], p["b_o"], residual=x2d,
                      layernorm=(p["ln1_g"], p["ln1_b"]))
    ff = fused_linear(h1, p["w_ff1"], p["b_ff1"], activation="relu")
    h2 = fused_linear(ff, p["w_ff2"], p["b_ff2"], residual=h1,
                      layernorm=(p["ln2_g"], p["ln2_b"]))
    return h2.reshape(S, Nb, E)


def _gat_layer(x, adj, w, att_src, att_dst, bias, G, N, heads, out_dim, concat):
    """Dense GATConv (add_self_loops=True, negative_slope=0.2, eval dropout)."""
    h = fused_linear(x, w, compute_dtype=jnp.bfloat16)                  # heavy GEMM in Pallas/bf16
    h = h.reshape(G, N, heads, out_dim)
    a_src = jnp.einsum("gnho,ho->gnh", h, att_src)
    a_dst = jnp.einsum("gnho,ho->gnh", h, att_dst)
    # TODO(synk): the tiny 19x19 per-graph edge-softmax/aggregation stays in plain JAX (a
    # ragged scatter-softmax has no useful dense Pallas tiling at this size).
    e = a_dst[:, :, None, :] + a_src[:, None, :, :]                     # (G, dst, src, H)
    e = jax.nn.leaky_relu(e, negative_slope=0.2)
    e = jnp.where(adj[None, :, :, None] > 0, e, -jnp.inf)
    attn = jax.nn.softmax(e, axis=2)
    out = jnp.einsum("gijh,gjho->giho", attn, h)
    if concat:
        out = out.reshape(G * N, heads * out_dim)
    else:
        out = out.mean(axis=2).reshape(G * N, out_dim)
    return out + bias


def _cross_attention(spatial, temporal, params, heads):
    """spatial: (B, W, N, E), temporal: (B, W, E) -> (B, W, N, E).
    TODO(synk): the reference feeds a 4-D query to nn.MultiheadAttention (invalid in PyTorch);
    interpreted here as every spatial node token attending over its batch's W temporal tokens."""
    B, W, N, E = spatial.shape
    dh = E // heads
    q2d = spatial.reshape(B * W * N, E)
    kv2d = temporal.reshape(B * W, E)
    q = fused_linear(q2d, params["ca_wq"], params["ca_bq"])
    kv = fused_linear(kv2d, params["ca_wkv"], params["ca_bkv"])
    k, v = jnp.split(kv, 2, axis=-1)
    qh = q.reshape(B, W * N, heads, dh).transpose(0, 2, 1, 3).reshape(B * heads, W * N, dh)
    kh = k.reshape(B, W, heads, dh).transpose(0, 2, 1, 3).reshape(B * heads, W, dh)
    vh = v.reshape(B, W, heads, dh).transpose(0, 2, 1, 3).reshape(B * heads, W, dh)
    oh = mha_attention(qh, kh, vh)                                      # (B*H, W*N, dh)
    o = oh.reshape(B, heads, W * N, dh).transpose(0, 2, 1, 3).reshape(B * W * N, E)
    out = fused_linear(o, params["ca_wo"], params["ca_bo"])
    return out.reshape(B, W, N, E)


# ---------------------------------------------------------------------------
# Full forward
# ---------------------------------------------------------------------------
def ctgat_forward(params, eeg, adj, pe_table, d_model=256, heads=8):
    B, W, T, N = eeg.shape
    BW = B * W

    # ----- CNN + transformer temporal branch (channels-last end-to-end, no transposes) -----
    x = eeg.reshape(BW, T, N)                                           # (BW, T, 19)
    x = _conv_bn_relu_block(x, params, 1)                               # (BW, T, 512)
    x = _maxpool_t(x)                                                   # (BW, T/2, 512)
    x = _conv_bn_relu_block(x, params, 2)                               # (BW, T/2, 128)
    x = _maxpool_t(x)                                                   # (BW, T/4, 128)
    x = _conv_bn_relu_block(x, params, 3, mean_over_t=True)             # conv3 + AvgPool fused -> (BW, 32)

    # Linear(32->256) with the positional-encoding add fused into the matmul epilogue.
    pe_rows = jnp.tile(pe_table[:W], (B, 1))                            # row (b,w) gets pe[w]
    t_feat = fused_linear(x, params["proj_w"], params["proj_b"], residual=pe_rows)

    # TransformerEncoder (default batch_first=False: axis 0 is treated as the sequence axis).
    h = t_feat.reshape(B, W, d_model)
    for lp in params["encoder"]:
        h = _encoder_layer(h, lp, heads)
    temporal_features = h                                               # (B, W, 256)

    # ----- GAT spatial branch -----
    node_x = eeg.transpose(0, 1, 3, 2).reshape(BW * N, T)               # eeg[b, w].T per graph
    g1 = _gat_layer(node_x, adj, params["gat1_w"], params["gat1_att_src"],
                    params["gat1_att_dst"], params["gat1_bias"],
                    G=BW, N=N, heads=4, out_dim=64, concat=True)
    g1 = jnp.maximum(g1, 0.0)
    g2 = _gat_layer(g1, adj, params["gat2_w"], params["gat2_att_src"],
                    params["gat2_att_dst"], params["gat2_bias"],
                    G=BW, N=N, heads=1, out_dim=256, concat=False)
    spatial_features = g2.reshape(B, W, N, d_model)

    # ----- Cross attention + classification head -----
    fused = _cross_attention(spatial_features, temporal_features, params, heads)
    fused = fused.mean(axis=2).mean(axis=1)                             # (B, 256)
    return fused_linear(fused, params["fc_w"], params["fc_b"])          # (B, num_classes)


# ---------------------------------------------------------------------------
# Parameter construction (deterministic)
# ---------------------------------------------------------------------------
def init_params(key, num_nodes=19, num_time_steps=1000, num_classes=1,
                d_model=256, heads=8, ffn=2048, num_layers=4):
    keys = iter(jax.random.split(key, 64))

    def nrm(shape, scale=0.05):
        return jax.random.normal(next(keys), shape, jnp.float32) * scale

    p = {}
    p["conv1_w"], p["conv1_b"] = nrm((512, num_nodes, 3)), jnp.zeros((512,), jnp.float32)
    p["conv2_w"], p["conv2_b"] = nrm((128, 512, 3)), jnp.zeros((128,), jnp.float32)
    p["conv3_w"], p["conv3_b"] = nrm((32, 128, 3)), jnp.zeros((32,), jnp.float32)
    for i, c in ((1, 512), (2, 128), (3, 32)):
        p[f"bn{i}_gamma"] = jnp.ones((c,), jnp.float32)
        p[f"bn{i}_beta"] = jnp.zeros((c,), jnp.float32)
        p[f"bn{i}_mean"] = jnp.zeros((c,), jnp.float32)
        p[f"bn{i}_var"] = jnp.ones((c,), jnp.float32)
    p["proj_w"], p["proj_b"] = nrm((32, d_model)), jnp.zeros((d_model,), jnp.float32)

    layers = []
    for _ in range(num_layers):
        layers.append(dict(
            w_qkv=nrm((d_model, 3 * d_model)), b_qkv=jnp.zeros((3 * d_model,), jnp.float32),
            w_o=nrm((d_model, d_model)), b_o=jnp.zeros((d_model,), jnp.float32),
            ln1_g=jnp.ones((d_model,), jnp.float32), ln1_b=jnp.zeros((d_model,), jnp.float32),
            w_ff1=nrm((d_model, ffn)), b_ff1=jnp.zeros((ffn,), jnp.float32),
            w_ff2=nrm((ffn, d_model)), b_ff2=jnp.zeros((d_model,), jnp.float32),
            ln2_g=jnp.ones((d_model,), jnp.float32), ln2_b=jnp.zeros((d_model,), jnp.float32),
        ))
    p["encoder"] = layers

    p["gat1_w"] = nrm((num_time_steps, 4 * 64))
    p["gat1_att_src"], p["gat1_att_dst"] = nrm((4, 64)), nrm((4, 64))
    p["gat1_bias"] = jnp.zeros((4 * 64,), jnp.float32)
    p["gat2_w"] = nrm((256, 256))
    p["gat2_att_src"], p["gat2_att_dst"] = nrm((1, 256)), nrm((1, 256))
    p["gat2_bias"] = jnp.zeros((256,), jnp.float32)

    p["ca_wq"], p["ca_bq"] = nrm((d_model, d_model)), jnp.zeros((d_model,), jnp.float32)
    p["ca_wkv"], p["ca_bkv"] = nrm((d_model, 2 * d_model)), jnp.zeros((2 * d_model,), jnp.float32)
    p["ca_wo"], p["ca_bo"] = nrm((d_model, d_model)), jnp.zeros((d_model,), jnp.float32)

    p["fc_w"], p["fc_b"] = nrm((d_model, num_classes)), jnp.zeros((num_classes,), jnp.float32)
    return p


# ---------------------------------------------------------------------------
# main
# ---------------------------------------------------------------------------
if __name__ == "__main__":
    # Small shapes consistent with the forward (T kept modest so the demo runs quickly;
    # the GAT weights are sized to T, matching the forward's data flow).
    B, W, T, N = 2, 4, 256, 19
    num_classes = 1

    key = jax.random.PRNGKey(0)
    k_x, k_p, k_c = jax.random.split(key, 3)
    eeg = jax.random.normal(k_x, (B, W, T, N), dtype=jnp.float32)

    # Deterministic ring graph + self loops (GATConv add_self_loops=True). adj[dst, src] = 1.
    src = jnp.arange(N)
    dst = (src + 1) % N
    adj = jnp.zeros((N, N), jnp.float32).at[
        jnp.concatenate([dst, src]), jnp.concatenate([src, dst])].set(1.0)
    adj = jnp.maximum(adj, jnp.eye(N, dtype=jnp.float32))

    params = init_params(k_p, num_nodes=N, num_time_steps=T, num_classes=num_classes)
    pe_table = make_positional_encoding_table(256, max_len=500)

    # --- quick correctness checks of the Pallas building blocks vs plain JAX ---
    ck = jax.random.split(k_c, 8)

    # 1) fused_linear: relu + residual (activation applied BEFORE residual, by design)
    xa = jax.random.normal(ck[0], (37, 57), jnp.float32)
    wa = jax.random.normal(ck[1], (57, 70), jnp.float32) * 0.1
    ba = jax.random.normal(ck[2], (70,), jnp.float32) * 0.1
    ra = jax.random.normal(ck[3], (37, 70), jnp.float32)
    got = fused_linear(xa, wa, ba, residual=ra, activation="relu")
    ref = jnp.maximum(xa @ wa + ba, 0.0) + ra
    assert jnp.allclose(got, ref, atol=5e-2, rtol=5e-2), "fused_linear mismatch"

    # 2) fused_linear with fused residual + LayerNorm epilogue
    xg = jax.random.normal(ck[4], (16, 256), jnp.float32)
    wg = jax.random.normal(ck[5], (256, 256), jnp.float32) * 0.05
    rg = jax.random.normal(ck[6], (16, 256), jnp.float32)
    gamma = 1.0 + 0.1 * jax.random.normal(ck[7], (256,), jnp.float32)
    beta = 0.1 * jax.random.normal(ck[0], (256,), jnp.float32)
    got = fused_linear(xg, wg, None, residual=rg, layernorm=(gamma, beta))
    y = xg @ wg + rg
    mu = y.mean(-1, keepdims=True)
    var = ((y - mu) ** 2).mean(-1, keepdims=True)
    ref = (y - mu) / jnp.sqrt(var + 1e-5) * gamma + beta
    assert jnp.allclose(got, ref, atol=2e-2, rtol=2e-2), "fused_linear+LN mismatch"

    # 3) conv1d(k=3,p=1)+relu kernel (bf16 compute) vs plain-JAX reference
    xc = jax.random.normal(ck[1], (2, 16, 19), jnp.float32)
    wc3 = jax.random.normal(ck[2], (3, 19, 32), jnp.float32) * 0.1
    bc = jax.random.normal(ck[3], (32,), jnp.float32) * 0.1
    xcp = jnp.pad(xc, ((0, 0), (1, 1), (0, 0)))
    refc = jnp.maximum(
        sum(jnp.einsum("btc,co->bto", xcp[:, d:d + 16, :], wc3[d]) for d in range(3)) + bc, 0.0)
    gotc = conv1d_k3_relu(xc, wc3, bc).astype(jnp.float32)
    assert jnp.allclose(gotc, refc, atol=5e-2, rtol=5e-2), "conv kernel mismatch"
    gotm = conv1d_k3_relu(xc, wc3, bc, mean_over_t=True, out_dtype=jnp.float32)
    assert jnp.allclose(gotm, refc.mean(axis=1), atol=5e-2, rtol=5e-2), "conv+mean mismatch"

    # 4) grouped MHA kernel vs plain JAX
    qt = jax.random.normal(ck[4], (6, 5, 32), jnp.float32)
    kt = jax.random.normal(ck[5], (6, 7, 32), jnp.float32)
    vt = jax.random.normal(ck[6], (6, 7, 32), jnp.float32)
    got = mha_attention(qt, kt, vt)
    s = jnp.einsum("bqd,bkd->bqk", qt, kt) / jnp.sqrt(32.0)
    ref = jnp.einsum("bqk,bkd->bqd", jax.nn.softmax(s, axis=-1), vt)
    assert jnp.allclose(got, ref, atol=5e-2, rtol=5e-2), "mha mismatch"

    # --- full forward ---
    fwd = jax.jit(ctgat_forward)
    out = jax.block_until_ready(fwd(params, eeg, adj, pe_table))

    assert out.shape == (B, num_classes)
    assert bool(jnp.all(jnp.isfinite(out)))
    print("KERNEL_OK")
</pallas_src>

<mosaic_0001>
module attributes {stable_mosaic.version = 11 : i64} {
  func.func @_linear_kernel(%arg0: i32, %arg1: i32, %arg2: i32, %arg3: memref<40x57xf32, #tpu.memory_space<vmem>>, %arg4: memref<57x70xf32, #tpu.memory_space<vmem>>, %arg5: memref<1x70xf32, #tpu.memory_space<vmem>>, %arg6: memref<40x70xf32, #tpu.memory_space<vmem>>, %arg7: memref<40x70xf32, #tpu.memory_space<vmem>>, %arg8: memref<40x70xf32, #tpu.memory_space<vmem>>) attributes {dimension_semantics = [#tpu.dimension_semantics<parallel>, #tpu.dimension_semantics<parallel>, #tpu.dimension_semantics<arbitrary>], iteration_bounds = array<i64: 1, 1, 1>, scalar_prefetch = 0 : i64, scratch_operands = 1 : i64, tpu.core_type = #tpu.core_type<tc>, window_params = [{transform_indices = @transform_0, window_bounds = array<i64: 40, 57>}, {transform_indices = @transform_1, window_bounds = array<i64: 57, 70>}, {transform_indices = @transform_2, window_bounds = array<i64: 1, 70>}, {transform_indices = @transform_3, window_bounds = array<i64: 40, 70>}, {transform_indices = @transform_4, window_bounds = array<i64: 40, 70>}]} {
    %c0_i32 = arith.constant 0 : i32
    %0 = arith.cmpi eq, %arg2, %c0_i32 : i32
    %1 = arith.extui %0 : i1 to i32
    %c0_i32_0 = arith.constant 0 : i32
    %2 = arith.cmpi ne, %1, %c0_i32_0 : i32
    scf.if %2 {
      %cst_10 = arith.constant 0.000000e+00 : f32
      %12 = vector.broadcast %cst_10 : f32 to vector<40x70xf32>
      %c0_11 = arith.constant 0 : index
      %c0_12 = arith.constant 0 : index
      %13 = vector.load %arg8[%c0_11, %c0_12] : memref<40x70xf32, #tpu.memory_space<vmem>>, vector<40x70xf32>
      tpu.vector_store %arg8[%c0_11, %c0_12], %12 {strides = array<i32>} : memref<40x70xf32, #tpu.memory_space<vmem>>, vector<40x70xf32>,
    } else {
    }
    %c0 = arith.constant 0 : index
    %c0_1 = arith.constant 0 : index
    %3 = vector.load %arg8[%c0, %c0_1] : memref<40x70xf32, #tpu.memory_space<vmem>>, vector<40x70xf32>
    %c0_2 = arith.constant 0 : index
    %c0_3 = arith.constant 0 : index
    %4 = vector.load %arg3[%c0_2, %c0_3] : memref<40x57xf32, #tpu.memory_space<vmem>>, vector<40x57xf32>
    %c0_4 = arith.constant 0 : index
    %c0_5 = arith.constant 0 : index
    %5 = vector.load %arg4[%c0_4, %c0_5] : memref<57x70xf32, #tpu.memory_space<vmem>>, vector<57x70xf32>
    %cst = arith.constant dense<0.000000e+00> : vector<40x70xf32>
    %6 = tpu.matmul %4, %5, %cst {dimension_numbers = #tpu.dot_dimension_numbers<[1], [0], [0], [1], [0, 0, 1, 1], [], []>} : vector<40x57xf32>, vector<57x70xf32>, vector<40x70xf32> -> vector<40x70xf32>
    %7 = arith.addf %3, %6 : vector<40x70xf32>
    %c0_6 = arith.constant 0 : index
    %c0_7 = arith.constant 0 : index
    %8 = vector.load %arg8[%c0_6, %c0_7] : memref<40x70xf32, #tpu.memory_space<vmem>>, vector<40x70xf32>
    tpu.vector_store %arg8[%c0_6, %c0_7], %7 {strides = array<i32>} : memref<40x70xf32, #tpu.memory_space<vmem>>, vector<40x70xf32>,
    %c0_i32_8 = arith.constant 0 : i32
    %9 = arith.cmpi eq, %arg2, %c0_i32_8 : i32
    %10 = arith.extui %9 : i1 to i32
    %c0_i32_9 = arith.constant 0 : i32
    %11 = arith.cmpi ne, %10, %c0_i32_9 : i32
    scf.if %11 {
      %c0_10 = arith.constant 0 : index
      %c0_11 = arith.constant 0 : index
      %12 = vector.load %arg8[%c0_10, %c0_11] : memref<40x70xf32, #tpu.memory_space<vmem>>, vector<40x70xf32>
      %c0_12 = arith.constant 0 : index
      %c0_13 = arith.constant 0 : index
      %13 = vector.load %arg5[%c0_12, %c0_13] : memref<1x70xf32, #tpu.memory_space<vmem>>, vector<1x70xf32>
      %14 = vector.broadcast %13 : vector<1x70xf32> to vector<40x70xf32>
      %15 = arith.addf %12, %14 : vector<40x70xf32>
      %cst_14 = arith.constant 0.000000e+00 : f32
      %16 = vector.broadcast %cst_14 : f32 to vector<40x70xf32>
      %17 = arith.maximumf %15, %16 : vector<40x70xf32>
      %c0_15 = arith.constant 0 : index
      %c0_16 = arith.constant 0 : index
      %18 = vector.load %arg6[%c0_15, %c0_16] : memref<40x70xf32, #tpu.memory_space<vmem>>, vector<40x70xf32>
      %19 = arith.addf %17, %18 : vector<40x70xf32>
      %c0_17 = arith.constant 0 : index
      %c0_18 = arith.constant 0 : index
      %20 = vector.load %arg7[%c0_17, %c0_18] : memref<40x70xf32, #tpu.memory_space<vmem>>, vector<40x70xf32>
      tpu.vector_store %arg7[%c0_17, %c0_18], %19 {strides = array<i32>} : memref<40x70xf32, #tpu.memory_space<vmem>>, vector<40x70xf32>,
    } else {
    }
    return
  }
  func.func @transform_0(%arg0: i32, %arg1: i32, %arg2: i32) -> (i32, i32) {
    %c0_i32 = arith.constant 0 : i32
    return %arg0, %arg2 : i32, i32
  }
  func.func @transform_1(%arg0: i32, %arg1: i32, %arg2: i32) -> (i32, i32) {
    %c0_i32 = arith.constant 0 : i32
    return %arg2, %arg1 : i32, i32
  }
  func.func @transform_2(%arg0: i32, %arg1: i32, %arg2: i32) -> (i32, i32) {
    %c0_i32 = arith.constant 0 : i32
    %c0_i32_0 = arith.constant 0 : i32
    return %c0_i32, %arg1 : i32, i32
  }
  func.func @transform_3(%arg0: i32, %arg1: i32, %arg2: i32) -> (i32, i32) {
    %c0_i32 = arith.constant 0 : i32
    return %arg0, %arg1 : i32, i32
  }
  func.func @transform_4(%arg0: i32, %arg1: i32, %arg2: i32) -> (i32, i32) {
    %c0_i32 = arith.constant 0 : i32
    return %arg0, %arg1 : i32, i32
  }
}

</mosaic_0001>

<bundles_post_ra>
// kernel: tpu_custom_call.1
= control target key start
LH: loop header
LB: loop body
LE: loop exit
PB: predicated region body
PF: predicated region fallthrough
CT: control target
= control target key end

     0   :  { %9 = vsyncpa [#allocation4], 0  ;;  %s567_s0 = inlined_call_operand.hbm [shape: f32[40,57], index: 0, kind: input, shape index: {}]   ;;  %s568_s1 = inlined_call_operand.hbm [shape: f32[57,70], index: 1, kind: input, shape index: {}]   ;;  %s569_s2 = inlined_call_operand.vmem [shape: f32[1,70], index: 2, kind: input, shape index: {}]   ;;  %s570_s3 = inlined_call_operand.hbm [shape: f32[40,70], index: 3, kind: input, shape index: {}]   ;;  %s571_s4 = inlined_call_operand.hbm [shape: f32[40,70], index: 4, kind: output, shape index: {}]  }
   0x1   :  { %10 = vsyncpa [#allocation7], 0 }
   0x2   :  { %11 = vsyncpa [#allocation5], 0  ;;  %s442_s15 = smov [#allocation6]   ;;  %s443_s17 = smov [#allocation3]  }
   0x3   :  { %s29_s16 = sshll.u32 %s442_s15, 4  ;;  %s17_s18 = sshll.u32 %s443_s17, 4  ;;  %s30_s16 = int_to_ptr.vmem [resolvable:$true] %s29_s16  ;;  %s477_s18 = int_to_ptr.vmem [resolvable:$true] %s17_s18 }
   0x4   :  { %s348_s21 = scalar_lea.hbm %s568_s1, 1024 }
   0x5   :  { %p349_p0 = scmp.ne.s32.totalorder %s568_s1, %s348_s21  ;;  %p352_p1 = scmp.lt.u32.totalorder %s348_s21, %s568_s1 }
   0x7   :  { %p354_p2 = pnand %p352_p1, %p349_p0 }
   0x9   :  { %357 = shalt.err (!%p354_p2)
}
   0xa   :  { %s358_s26 = scalar_lea.vmem %s30_s16, 1024  ;;  %p363_p4 = scmp.lt.s32.totalorder %s30_s16, %s30_s16 }
   0xb   :  { %p359_p3 = scmp.ne.s32.totalorder %s30_s16, %s358_s26  ;;  %p364_p5 = scmp.lt.s32.totalorder %s358_s26, %s358_s26 }
   0xd   :  { %p365_p6 = por %p364_p5, %p363_p4 }
   0xf   :  { %p366_p7 = pnand %p365_p6, %p359_p3 }
  0x11   :  { %369 = shalt.err (!%p366_p7)
}
  0x12   :  { %s444_s27 = smov 128   ;;  %s445_s28 = smov 8  }
  0x13   :  { %35 = dma.hbm_to_vmem [thread:$0]  %s568_s1, 1024, %s30_s16, [#allocation7], %s444_s27, %s444_s27, %s445_s28  }
  0x14   :  { %s370_s7 = scalar_lea.hbm %s567_s0, 640 }
  0x15   :  { %p371_p8 = scmp.ne.s32.totalorder %s567_s0, %s370_s7  ;;  %p374_p9 = scmp.lt.u32.totalorder %s370_s7, %s567_s0 }
  0x17   :  { %p376_p10 = pnand %p374_p9, %p371_p8 }
  0x19   :  { %379 = shalt.err (!%p376_p10)
}
  0x1a   :  { %s380_s12 = scalar_lea.vmem %s477_s18, 640  ;;  %p385_p12 = scmp.lt.s32.totalorder %s477_s18, %s477_s18 }
  0x1b   :  { %p381_p11 = scmp.ne.s32.totalorder %s477_s18, %s380_s12  ;;  %p386_p13 = scmp.lt.s32.totalorder %s380_s12, %s380_s12 }
  0x1d   :  { %p387_p0 = por %p386_p13, %p385_p12 }
  0x1f   :  { %p388_p1 = pnand %p387_p0, %p381_p11 }
  0x21   :  { %391 = shalt.err (!%p388_p1)
}
  0x22   :  { %23 = dma.hbm_to_vmem [thread:$0]  %s567_s0, 640, %s477_s18, [#allocation4], %s444_s27, %s444_s27, %s445_s28  }
  0x23   :  { %s446_s14 = smov [#allocation8]   ;;  %s392_s19 = scalar_lea.hbm %s570_s3, 640 }
  0x24   :  { %s43_s15 = sshll.u32 %s446_s14, 4  ;;  %p393_p2 = scmp.ne.s32.totalorder %s570_s3, %s392_s19  ;;  %s44_s15 = int_to_ptr.vmem [resolvable:$true] %s43_s15 }
  0x25   :  { %p396_p3 = scmp.lt.u32.totalorder %s392_s19, %s570_s3 }
  0x27   :  { %p398_p4 = pnand %p396_p3, %p393_p2 }
  0x29   :  { %401 = shalt.err (!%p398_p4)
}
  0x2a   :  { %s402_s24 = scalar_lea.vmem %s44_s15, 640  ;;  %p407_p6 = scmp.lt.s32.totalorder %s44_s15, %s44_s15 }
  0x2b   :  { %p403_p5 = scmp.ne.s32.totalorder %s44_s15, %s402_s24  ;;  %p408_p7 = scmp.lt.s32.totalorder %s402_s24, %s402_s24 }
  0x2d   :  { %p409_p8 = por %p408_p7, %p407_p6 }
  0x2f   :  { %p410_p9 = pnand %p409_p8, %p403_p5 }
  0x31   :  { %413 = shalt.err (!%p410_p9)
}
  0x32   :  { %49 = dma.hbm_to_vmem [thread:$0]  %s570_s3, 640, %s44_s15, [#allocation7], %s444_s27, %s444_s27, %s445_s28  }
  0x33   :  { %436 = dma.done.wait [#allocation4], 640  }
  0x34   :  { %437 = vsyncadd [#allocation4], 4294966656 }
  0x35   :  { %438 = dma.done.wait [#allocation7], 1664  }
  0x36   :  { %439 = vsyncadd [#allocation7], 4294965632  ;;  %v447_v0 = vmov 0.0|0.0   ;;  %vm63_vm0 = vcmask 572416   ;;  %vm448_vm1 = vmmov 0   ;;  %v449_v1 = vmov 0.0  }
  0x37   :  { %317 = vmatprep.subr.bf16.mxu0 %v447_v0  ;;  %330 = vmatprep.subr.bf16.mxu1 %v447_v0  ;;  %64 = vst.msk [vmem:[#allocation2] sm:$0xff] %vm63_vm0, %v449_v1  ;;  %65 = vst.msk [vmem:[#allocation2 + $0x8] sm:$0xff] %vm63_vm0, %v449_v1  ;;  %v79_v2 = vld [vmem:[#allocation6] sm:$0xff]  ;;  %v80_v3 = vld [vmem:[#allocation6 + $0x8] sm:$0xff]  ;;  %vm103_vm2 = vcmask 1040384   ;;  %vm450_vm3 = vmmov 1  }
  0x38   :  { %302 = vmatprep.mubr.msk.f32.mxu0 %vm448_vm1, %v449_v1  ;;  %311 = vmatprep.mubr.msk.f32.mxu1 %vm448_vm1, %v449_v1  ;;  %66 = vst.msk [vmem:[#allocation2 + $0x10] sm:$0xff] %vm63_vm0, %v449_v1  ;;  %67 = vst.msk [vmem:[#allocation2 + $0x18] sm:$0xff] %vm63_vm0, %v449_v1  ;;  %v81_v4 = vld [vmem:[#allocation6 + $0x10] sm:$0xff]  ;;  %v318_v5 = vpack.c.bf16 %v80_v3, %v79_v2  ;;  %v82_v6 = vld [vmem:[#allocation6 + $0x18] sm:$0xff]  ;;  %vm87_vm5 = vcmask 465920  }
  0x39   :  { %68 = vst.msk [vmem:[#allocation2 + $0x20] sm:$0xff] %vm63_vm0, %v449_v1  ;;  %v321_v7 = vpack.c.bf16 %v82_v6, %v81_v4  ;;  %v83_v8 = vld [vmem:[#allocation6 + $0x20] sm:$0xff]  ;;  %v84_v9 = vld [vmem:[#allocation6 + $0x28] sm:$0xff]  ;;  %v85_v11 = vld [vmem:[#allocation6 + $0x30] sm:$0xff] }
  0x3a   :  { %319 = vmatpush3.bf16.msra.mxu0 %v318_v5  ;;  %334 = vmatpush3.bf16.msra.mxu1 %v318_v5  ;;  %v324_v10 = vpack.c.bf16 %v84_v9, %v83_v8  ;;  %v86_v12 = vld [vmem:[#allocation6 + $0x38] sm:$0x1]  ;;  %vm328_vm4 = vmpackc.low %vm103_vm2, %vm450_vm3  ;;  %v77_v15 = vld [vmem:[#allocation3 + $0x18] sm:$0xff] }
  0x3b   :  { %320 = vmatprep.subr.bf16.mxu0 %v447_v0  ;;  %331 = vmatprep.subr.bf16.mxu1 %v447_v0  ;;  %v327_v13 = vpack.c.bf16 %v86_v12, %v85_v11  ;;  %v74_v14 = vld [vmem:[#allocation3] sm:$0xff]  ;;  %v75_v16 = vld [vmem:[#allocation3 + $0x8] sm:$0xff]  ;;  %v76_v18 = vld [vmem:[#allocation3 + $0x10] sm:$0xff] }
  0x3c   :  { %v78_v17 = vld [vmem:[#allocation3 + $0x20] sm:$0xff]  ;;  %v272_v37 = vld [vmem:[%s569_s2] ss:$0 sm:$0xff]  ;;  %v233_v44 = vld [vmem:[#allocation8] sm:$0xff]  ;;  %s451_s2 = smov [#allocation9]  }
  0x3d   :  { %v236_v45 = vld [vmem:[#allocation8 + $0x18] sm:$0xff]  ;;  %v234_v54 = vld [vmem:[#allocation8 + $0x8] sm:$0xff]  ;;  %v237_v55 = vld [vmem:[#allocation8 + $0x20] sm:$0xff]  ;;  %s253_s26 = sshll.u32 %s451_s2, 4  ;;  %s254_s26 = int_to_ptr.vmem [resolvable:$true] %s253_s26 }
  0x3e   :  { %322 = vmatpush3.bf16.msra.mxu0 %v321_v7  ;;  %335 = vmatpush3.bf16.msra.mxu1 %v321_v7  ;;  %v69_v19 = vld [vmem:[#allocation2] sm:$0xff]  ;;  %v70_v27 = vld [vmem:[#allocation2 + $0x8] sm:$0xff]  ;;  %s414_s29 = scalar_lea.vmem %s254_s26, 640  ;;  %p419_p11 = scmp.lt.s32.totalorder %s254_s26, %s254_s26 }
  0x3f   :  { %323 = vmatprep.subr.bf16.mxu0 %v447_v0  ;;  %332 = vmatprep.subr.bf16.mxu1 %v447_v0  ;;  %v72_v20 = vld [vmem:[#allocation2 + $0x18] sm:$0xff]  ;;  %v71_v35 = vld [vmem:[#allocation2 + $0x10] sm:$0xff]  ;;  %v235_v62 = vld [vmem:[#allocation8 + $0x10] sm:$0xff]  ;;  %p415_p10 = scmp.ne.s32.totalorder %s254_s26, %s414_s29  ;;  %p420_p12 = scmp.lt.s32.totalorder %s414_s29, %s414_s29 }
  0x40   :  { %v73_v28 = vld [vmem:[#allocation2 + $0x20] sm:$0xff] }
  0x41   :  { %p421_p13 = por %p420_p12, %p419_p11 }
  0x42   :  { %325 = vmatpush3.bf16.msra.mxu0 %v324_v10  ;;  %336 = vmatpush3.bf16.msra.mxu1 %v324_v10 }
  0x43   :  { %326 = vmatprep.subr.bf16.mxu0 %v447_v0  ;;  %333 = vmatprep.subr.bf16.mxu1 %v447_v0  ;;  %p422_p0 = pnand %p421_p13, %p415_p10 }
  0x46   :  { %329 = vmatpush3.bf16.msk.msra.mxu0 %vm328_vm4, %v327_v13  ;;  %337 = vmatpush3.bf16.msk.msra.mxu1 %vm328_vm4, %v327_v13 }
  0x49   :  { %303 = vmatmul.mubr.msk.f32.vlgmr.msra.gmra.mrb[0].mxu0 %vm87_vm5, %v74_v14  ;;  %312 = vmatmul.mubr.msk.f32.vlgmr.msra.gmra.mrb[0].mxu1 %vm87_vm5, %v77_v15 }
  0x4a   :  { %305 = vmatprep.mubr.msk.f32.mxu0 %vm448_vm1, %v449_v1  ;;  %314 = vmatprep.mubr.msk.f32.mxu1 %vm448_vm1, %v449_v1 }
  0x4d   :  { %306 = vmatmul.mubr.msk.f32.gmra.mrb[2].mxu0 %vm87_vm5, %v75_v16  ;;  %315 = vmatmul.mubr.msk.f32.gmra.mrb[2].mxu1 %vm87_vm5, %v78_v17 }
  0x4e   :  { %308 = vmatprep.mubr.msk.f32.mxu0 %vm448_vm1, %v449_v1 }
  0x51   :  { %309 = vmatmul.mubr.msk.f32.gmra.mrb[4].mxu0 %vm87_vm5, %v76_v18 }
 0x11c   :  { %v173_v21 = vpop.f32.mrb[0].mxu0  ;;  %v188_v22 = vpop.f32.mrb[0].mxu1 }
 0x11d   :  { %v197_v23 = vadd.f32 %v173_v21, %v69_v19  ;;  %v304_v24 = vpop.f32.mrb[1].mxu0  ;;  %v200_v25 = vadd.f32 %v188_v22, %v72_v20  ;;  %v313_v26 = vpop.f32.mrb[1].mxu1 }
 0x11f   :  { %203 = vst.msk [vmem:[#allocation2] sm:$0xff] %vm63_vm0, %v197_v23  ;;  %206 = vst.msk [vmem:[#allocation2 + $0x18] sm:$0xff] %vm63_vm0, %v200_v25 }
 0x120   :  { %v178_v29 = vpop.f32.mrb[2].mxu0  ;;  %v193_v30 = vpop.f32.mrb[2].mxu1 }
 0x121   :  { %v198_v31 = vadd.f32 %v178_v29, %v70_v27  ;;  %v307_v32 = vpop.f32.mrb[3].mxu0  ;;  %v201_v33 = vadd.f32 %v193_v30, %v73_v28  ;;  %v316_v34 = vpop.f32.mrb[3].mxu1 }
 0x123   :  { %204 = vst.msk [vmem:[#allocation2 + $0x8] sm:$0xff] %vm63_vm0, %v198_v31  ;;  %207 = vst.msk [vmem:[#allocation2 + $0x20] sm:$0xff] %vm63_vm0, %v201_v33 }
 0x124   :  { %v183_v36 = vpop.f32.mrb[4].mxu0 }
 0x125   :  { %v199_v38 = vadd.f32 %v183_v36, %v71_v35  ;;  %v310_v39 = vpop.f32.mrb[5].mxu0 }
 0x126   :  { %v211_v40 = vld [vmem:[#allocation2] sm:$0xff]  ;;  %v214_v41 = vld [vmem:[#allocation2 + $0x18] sm:$0xff] }
 0x127   :  { %205 = vst.msk [vmem:[#allocation2 + $0x10] sm:$0xff] %vm63_vm0, %v199_v38  ;;  %v223_v42 = vadd.f32 %v272_v37, %v211_v40  ;;  %v226_v43 = vadd.f32 %v272_v37, %v214_v41 }
 0x129   :  { %v228_v46 = vmax.f32 %v223_v42, 0.0  ;;  %v231_v47 = vmax.f32 %v226_v43, 0.0 }
 0x12a   :  { %v212_v48 = vld [vmem:[#allocation2 + $0x8] sm:$0xff]  ;;  %v215_v49 = vld [vmem:[#allocation2 + $0x20] sm:$0xff] }
 0x12b   :  { %v224_v50 = vadd.f32 %v272_v37, %v212_v48  ;;  %v227_v51 = vadd.f32 %v272_v37, %v215_v49  ;;  %v238_v52 = vadd.f32 %v233_v44, %v228_v46  ;;  %v241_v53 = vadd.f32 %v236_v45, %v231_v47 }
 0x12d   :  { %v229_v56 = vmax.f32 %v224_v50, 0.0  ;;  %v232_v57 = vmax.f32 %v227_v51, 0.0  ;;  %243 = vst.msk [vmem:[#allocation9] sm:$0xff] %vm63_vm0, %v238_v52  ;;  %246 = vst.msk [vmem:[#allocation9 + $0x18] sm:$0xff] %vm63_vm0, %v241_v53 }
 0x12e   :  { %v213_v58 = vld [vmem:[#allocation2 + $0x10] sm:$0xff] }
 0x12f   :  { %v225_v59 = vadd.f32 %v272_v37, %v213_v58  ;;  %v239_v60 = vadd.f32 %v234_v54, %v229_v56  ;;  %v242_v61 = vadd.f32 %v237_v55, %v232_v57 }
 0x131   :  { %v230_v63 = vmax.f32 %v225_v59, 0.0  ;;  %244 = vst.msk [vmem:[#allocation9 + $0x8] sm:$0xff] %vm63_vm0, %v239_v60  ;;  %247 = vst.msk [vmem:[#allocation9 + $0x20] sm:$0xff] %vm63_vm0, %v242_v61 }
 0x133   :  { %v240_v0 = vadd.f32 %v235_v62, %v230_v63 }
 0x135   :  { %245 = vst.msk [vmem:[#allocation9 + $0x10] sm:$0xff] %vm63_vm0, %v240_v0 }
 0x136   :  { %425 = shalt.err (!%p422_p0)
}
 0x137   :  { %s426_s6 = scalar_lea.hbm %s571_s4, 640 }
 0x138   :  { %p427_p1 = scmp.ne.s32.totalorder %s571_s4, %s426_s6  ;;  %p430_p2 = scmp.lt.u32.totalorder %s426_s6, %s571_s4 }
 0x13a   :  { %p432_p3 = pnand %p430_p2, %p427_p1 }
 0x13c   :  { %435 = shalt.err (!%p432_p3)
}
 0x13d   :  { %259 = dma.vmem_to_hbm [thread:$0]  %s254_s26, 640, %s571_s4, [#allocation5], %s444_s27, %s444_s27, %s445_s28  }
 0x13e   :  { %440 = dma.done.wait [#allocation5], 640  }
 0x13f   :  { %441 = vsyncadd [#allocation5], 4294966656 }
 0x140   :  { %263 = vsyncpa [#allocation4], 1 }
 0x141   :  { %264 = vsyncpa [#allocation7], 1 }
 0x142   :  { %265 = vsyncpa [#allocation5], 1 }

</bundles_post_ra>
